<compile_context>
chip_gen: v6e
topology: v6e:2x2x1
jax: 0.10.0
libtpu: 0.0.40
codegen_flags: <defaults>
</compile_context>

<pallas_src>
import jax
import jax.numpy as jnp
import numpy as np
from jax import lax
from jax.experimental import pallas as pl
from jax.experimental.pallas import tpu as pltpu


# ----------------------------- model config ---------------------------------
FIELD_DIMS = (16, 24)          # [n_users, n_items]
NUM_FIELDS = len(FIELD_DIMS)   # 2
EMBED_DIM = 16
MLP_DIMS = (32, 16)
EMBED_OUT_DIM = NUM_FIELDS * EMBED_DIM      # 32
BATCH = 8
MAX_TILE_B = 4096              # lanes per grid step (batch is on the lane axis)
MXU_DTYPE = jnp.bfloat16       # MXU-operand dtype (f32 accumulation kept)


def _round_up(x, m):
    return ((x + m - 1) // m) * m


def _choose_tile(b):
    """tile_b (multiple of 128), padded batch, #tiles (>=2 when batch allows)."""
    b128 = _round_up(max(b, 1), 128)
    if b128 > MAX_TILE_B:
        n = -(-b128 // MAX_TILE_B)
        tile_b = _round_up(-(-b128 // n), 128)
    elif b128 >= 256:
        tile_b = _round_up(b128 // 2, 128)   # >= 2 tiles -> feed both v7x TCs
    else:
        tile_b = b128
    b_pad = _round_up(b128, tile_b)
    return tile_b, b_pad, b_pad // tile_b


# ------------------------------ Pallas kernel -------------------------------
def ncf_kernel(ids_ref,             # (2, TB) int32: row0 = user ids, row1 = item ids
               tu_ref, ti_ref,      # (E+M0, Nu), (E+M0, Ni) pre-contracted tables (bf16)
               w2t_ref,             # (M1, M0) folded-BN layer-2 weight, transposed (bf16)
               b1_ref, b2_ref,      # (M0, 1), (M1, 1) folded-BN biases (f32)
               wfg_ref, wfh_ref,    # (E, 1), (M1, 1) final-fc weight columns (f32)
               bf_ref,              # (1, 1) final-fc bias
               o_ref):              # (1, TB) scores (lane-dense output row)
    tb = ids_ref.shape[1]
    n_users = tu_ref.shape[1]
    n_items = ti_ref.shape[1]
    e = wfg_ref.shape[0]
    mxu_dt = tu_ref.dtype

    uid = ids_ref[0:1, :]                                   # (1, TB) int32
    iid = ids_ref[1:2, :]

    # One-hot selectors, feature-major: (n_field, TB), exact in bf16.
    oh_u = (lax.broadcasted_iota(jnp.int32, (n_users, tb), 0) == uid).astype(mxu_dt)
    oh_i = (lax.broadcasted_iota(jnp.int32, (n_items, tb), 0) == iid).astype(mxu_dt)

    # Fused gather + layer-1 contraction: (E+M0, N_field) @ (N_field, TB) on the MXU.
    ufull = jnp.dot(tu_ref[...], oh_u, preferred_element_type=jnp.float32)   # (E+M0, TB)
    ifull = jnp.dot(ti_ref[...], oh_i, preferred_element_type=jnp.float32)   # (E+M0, TB)

    # GMF branch: pure VPU elementwise product in f32.
    gmf = ufull[:e, :] * ifull[:e, :]                       # (E, TB)

    # MLP branch (BN folded): h1 rows live at [E:] of the pre-contracted result.
    h1 = jnp.maximum(ufull[e:, :] + ifull[e:, :] + b1_ref[...], 0.0)         # (M0, TB)
    h2 = jnp.dot(w2t_ref[...], h1.astype(mxu_dt),
                 preferred_element_type=jnp.float32) + b2_ref[...]           # (M1, TB)
    h2 = jnp.maximum(h2, 0.0)

    # Final fc (width 1): VPU multiply + sublane (feature) reduce -> (1, TB).
    score = jnp.sum(gmf * wfg_ref[...] + h2 * wfh_ref[...],
                    axis=0, keepdims=True) + bf_ref[...]
    o_ref[...] = score


# ------------------------------- wrapper -------------------------------------
def ncf_forward(x_idx, params, *, mxu_dtype=MXU_DTYPE):
    """x_idx: (B, NUM_FIELDS) int32 raw per-field ids -> (B,) f32 scores."""
    B = x_idx.shape[0]
    tile_b, b_pad, n_tiles = _choose_tile(B)

    # Lane-dense ids: one (2, b_pad) int32 operand (row0 = user, row1 = item).
    ids = x_idx.astype(jnp.int32).T                          # (2, B)
    if b_pad != B:
        ids = jnp.pad(ids, ((0, 0), (0, b_pad - B)))         # pad with id 0 (valid)

    # Split the shared table into per-field tables (field offsets applied here).
    table = params["embedding"]
    emb_u = table[:FIELD_DIMS[0]]                            # (Nu, E)
    emb_i = table[FIELD_DIMS[0]:]                            # (Ni, E)

    # Fold eval-mode BatchNorm into the Linear layers.
    eps = 1e-5

    def fold_bn(w, b, gamma, beta, mean, var):
        scale = gamma / jnp.sqrt(var + eps)
        shift = beta - mean * scale
        return w * scale[None, :], b * scale + shift

    w1f, b1f = fold_bn(params["w1"], params["b1"], *params["bn1"])   # (2E, M0), (M0,)
    w2f, b2f = fold_bn(params["w2"], params["b2"], *params["bn2"])   # (M0, M1), (M1,)
    w1u, w1i = w1f[:EMBED_DIM], w1f[EMBED_DIM:]

    # Pre-contract W1 into the tables and transpose to feature-major (bf16 MXU operands).
    tuT = jnp.concatenate([emb_u, emb_u @ w1u], axis=1).T.astype(mxu_dtype)  # (E+M0, Nu)
    tiT = jnp.concatenate([emb_i, emb_i @ w1i], axis=1).T.astype(mxu_dtype)  # (E+M0, Ni)
    w2T = w2f.T.astype(mxu_dtype)                                            # (M1, M0)

    b1c = b1f[:, None].astype(jnp.float32)                   # (M0, 1)
    b2c = b2f[:, None].astype(jnp.float32)                   # (M1, 1)
    wfc = params["wfc"]                                      # (E+M1, 1)
    wfg = wfc[:EMBED_DIM]                                    # (E, 1)  gmf part
    wfh = wfc[EMBED_DIM:]                                    # (M1, 1) mlp part
    bf = params["bfc"][:, None]                              # (1, 1)

    id_spec = pl.BlockSpec((2, tile_b), lambda i: (0, i))    # lane-dense id stream

    def const_spec(shape):
        # Full-array block, constant block index -> fetched once, VMEM-resident.
        return pl.BlockSpec(shape, lambda i: (0, 0))

    consts = (tuT, tiT, w2T, b1c, b2c, wfg, wfh, bf)
    in_specs = [id_spec] + [const_spec(c.shape) for c in consts]

    out = pl.pallas_call(
        ncf_kernel,
        out_shape=jax.ShapeDtypeStruct((1, b_pad), jnp.float32),   # lane-dense output row
        grid=(n_tiles,),
        in_specs=in_specs,
        out_specs=pl.BlockSpec((1, tile_b), lambda i: (0, i)),
        compiler_params=pltpu.CompilerParams(
            dimension_semantics=("parallel",)),              # shards across v7x's 2 TCs
    )(ids, *consts)

    return out[0, :B]


# --------------------------- pure-JAX reference ------------------------------
def ncf_reference(x_idx, params):
    eps = 1e-5
    table = params["embedding"]
    offsets = jnp.array([0, FIELD_DIMS[0]], jnp.int32)
    emb = table[x_idx + offsets[None, :]]                    # (B, 2, E)
    user_x, item_x = emb[:, 0], emb[:, 1]
    gmf = user_x * item_x

    def bn(x, gamma, beta, mean, var):
        return (x - mean) / jnp.sqrt(var + eps) * gamma + beta

    h = emb.reshape(x_idx.shape[0], -1)                      # (B, 2E)
    h = h @ params["w1"] + params["b1"]
    h = jnp.maximum(bn(h, *params["bn1"]), 0.0)
    h = h @ params["w2"] + params["b2"]
    h = jnp.maximum(bn(h, *params["bn2"]), 0.0)
    z = jnp.concatenate([gmf, h], axis=1)
    return (z @ params["wfc"] + params["bfc"])[:, 0]


# ------------------------------ param init ----------------------------------
def init_params(key):
    ks = jax.random.split(key, 8)
    total_rows = sum(FIELD_DIMS)
    params = {
        "embedding": jax.random.normal(ks[0], (total_rows, EMBED_DIM), jnp.float32) * 0.1,
        "w1": jax.random.normal(ks[1], (EMBED_OUT_DIM, MLP_DIMS[0]), jnp.float32) * 0.1,
        "b1": jax.random.normal(ks[2], (MLP_DIMS[0],), jnp.float32) * 0.01,
        "w2": jax.random.normal(ks[3], (MLP_DIMS[0], MLP_DIMS[1]), jnp.float32) * 0.1,
        "b2": jax.random.normal(ks[4], (MLP_DIMS[1],), jnp.float32) * 0.01,
        "wfc": jax.random.normal(ks[5], (EMBED_DIM + MLP_DIMS[1], 1), jnp.float32) * 0.1,
        "bfc": jax.random.normal(ks[6], (1,), jnp.float32) * 0.01,
        # BatchNorm1d params (eval mode): gamma, beta, running_mean, running_var
        "bn1": (jnp.ones((MLP_DIMS[0],), jnp.float32),
                jnp.zeros((MLP_DIMS[0],), jnp.float32),
                jnp.zeros((MLP_DIMS[0],), jnp.float32),
                jnp.ones((MLP_DIMS[0],), jnp.float32)),
        "bn2": (jnp.ones((MLP_DIMS[1],), jnp.float32),
                jnp.zeros((MLP_DIMS[1],), jnp.float32),
                jnp.zeros((MLP_DIMS[1],), jnp.float32),
                jnp.ones((MLP_DIMS[1],), jnp.float32)),
    }
    return params


# -------------------------------- main ---------------------------------------
if __name__ == "__main__":
    key = jax.random.PRNGKey(0)
    pkey, dkey_u, dkey_i = jax.random.split(key, 3)
    params = init_params(pkey)

    # synthetic categorical inputs: (B, 2) = [user_id, item_id], raw per-field ids
    user_ids = jax.random.randint(dkey_u, (BATCH,), 0, FIELD_DIMS[0], dtype=jnp.int32)
    item_ids = jax.random.randint(dkey_i, (BATCH,), 0, FIELD_DIMS[1], dtype=jnp.int32)
    x_idx = jnp.stack([user_ids, item_ids], axis=1)          # (B, 2) int32

    out = ncf_forward(x_idx, params)
    jax.block_until_ready(out)
    assert out.shape == (BATCH,)

    ref = ncf_reference(x_idx, params)
    np.testing.assert_allclose(np.asarray(out), np.asarray(ref), rtol=2e-2, atol=2e-2)
    print("KERNEL_OK")
</pallas_src>

<mosaic_0001>
module attributes {stable_mosaic.version = 11 : i64} {
  func.func @ncf_kernel(%arg0: i32, %arg1: memref<2x128xi32, #tpu.memory_space<vmem>>, %arg2: memref<48x16xbf16, #tpu.memory_space<vmem>>, %arg3: memref<48x24xbf16, #tpu.memory_space<vmem>>, %arg4: memref<16x32xbf16, #tpu.memory_space<vmem>>, %arg5: memref<32x1xf32, #tpu.memory_space<vmem>>, %arg6: memref<16x1xf32, #tpu.memory_space<vmem>>, %arg7: memref<16x1xf32, #tpu.memory_space<vmem>>, %arg8: memref<16x1xf32, #tpu.memory_space<vmem>>, %arg9: memref<1x1xf32, #tpu.memory_space<vmem>>, %arg10: memref<1x128xf32, #tpu.memory_space<vmem>>) attributes {dimension_semantics = [#tpu.dimension_semantics<parallel>], iteration_bounds = array<i64: 1>, scalar_prefetch = 0 : i64, scratch_operands = 0 : i64, tpu.core_type = #tpu.core_type<tc>, window_params = [{transform_indices = @transform_0, window_bounds = array<i64: 2, 128>}, {pipeline_mode = #tpu.pipeline_mode<synchronous>, transform_indices = @transform_1, window_bounds = array<i64: 48, 16>}, {pipeline_mode = #tpu.pipeline_mode<synchronous>, transform_indices = @transform_2, window_bounds = array<i64: 48, 24>}, {pipeline_mode = #tpu.pipeline_mode<synchronous>, transform_indices = @transform_3, window_bounds = array<i64: 16, 32>}, {pipeline_mode = #tpu.pipeline_mode<synchronous>, transform_indices = @transform_4, window_bounds = array<i64: 32, 1>}, {pipeline_mode = #tpu.pipeline_mode<synchronous>, transform_indices = @transform_5, window_bounds = array<i64: 16, 1>}, {pipeline_mode = #tpu.pipeline_mode<synchronous>, transform_indices = @transform_6, window_bounds = array<i64: 16, 1>}, {pipeline_mode = #tpu.pipeline_mode<synchronous>, transform_indices = @transform_7, window_bounds = array<i64: 16, 1>}, {pipeline_mode = #tpu.pipeline_mode<synchronous>, transform_indices = @transform_8, window_bounds = array<i64: 1, 1>}, {transform_indices = @transform_9, window_bounds = array<i64: 1, 128>}]} {
    %c0 = arith.constant 0 : index
    %c0_0 = arith.constant 0 : index
    %0 = vector.load %arg1[%c0, %c0_0] : memref<2x128xi32, #tpu.memory_space<vmem>>, vector<1x128xi32>
    %c1 = arith.constant 1 : index
    %c0_1 = arith.constant 0 : index
    %1 = vector.load %arg1[%c1, %c0_1] : memref<2x128xi32, #tpu.memory_space<vmem>>, vector<1x128xi32>
    %2 = tpu.iota {dimensions = array<i32: 0>} : vector<16x128xi32>
    %3 = vector.broadcast %0 : vector<1x128xi32> to vector<16x128xi32>
    %4 = arith.cmpi eq, %2, %3 : vector<16x128xi32>
    %5 = arith.extui %4 : vector<16x128xi1> to vector<16x128xi32>
    %6 = arith.sitofp %5 : vector<16x128xi32> to vector<16x128xf32>
    %7 = arith.truncf %6 : vector<16x128xf32> to vector<16x128xbf16>
    %8 = tpu.iota {dimensions = array<i32: 0>} : vector<24x128xi32>
    %9 = vector.broadcast %1 : vector<1x128xi32> to vector<24x128xi32>
    %10 = arith.cmpi eq, %8, %9 : vector<24x128xi32>
    %11 = arith.extui %10 : vector<24x128xi1> to vector<24x128xi32>
    %12 = arith.sitofp %11 : vector<24x128xi32> to vector<24x128xf32>
    %13 = arith.truncf %12 : vector<24x128xf32> to vector<24x128xbf16>
    %c0_2 = arith.constant 0 : index
    %c0_3 = arith.constant 0 : index
    %14 = vector.load %arg2[%c0_2, %c0_3] : memref<48x16xbf16, #tpu.memory_space<vmem>>, vector<48x16xbf16>
    %cst = arith.constant dense<0.000000e+00> : vector<48x128xf32>
    %15 = tpu.matmul %14, %7, %cst {dimension_numbers = #tpu.dot_dimension_numbers<[1], [0], [0], [1], [0, 0, 1, 1], [], []>} : vector<48x16xbf16>, vector<16x128xbf16>, vector<48x128xf32> -> vector<48x128xf32>
    %c0_4 = arith.constant 0 : index
    %c0_5 = arith.constant 0 : index
    %16 = vector.load %arg3[%c0_4, %c0_5] : memref<48x24xbf16, #tpu.memory_space<vmem>>, vector<48x24xbf16>
    %cst_6 = arith.constant dense<0.000000e+00> : vector<48x128xf32>
    %17 = tpu.matmul %16, %13, %cst_6 {dimension_numbers = #tpu.dot_dimension_numbers<[1], [0], [0], [1], [0, 0, 1, 1], [], []>} : vector<48x24xbf16>, vector<24x128xbf16>, vector<48x128xf32> -> vector<48x128xf32>
    %18 = vector.extract_strided_slice %15 {offsets = [0, 0], sizes = [16, 128], strides = [1, 1]} : vector<48x128xf32> to vector<16x128xf32>
    %19 = vector.extract_strided_slice %17 {offsets = [0, 0], sizes = [16, 128], strides = [1, 1]} : vector<48x128xf32> to vector<16x128xf32>
    %20 = arith.mulf %18, %19 : vector<16x128xf32>
    %21 = vector.extract_strided_slice %15 {offsets = [16, 0], sizes = [32, 128], strides = [1, 1]} : vector<48x128xf32> to vector<32x128xf32>
    %22 = vector.extract_strided_slice %17 {offsets = [16, 0], sizes = [32, 128], strides = [1, 1]} : vector<48x128xf32> to vector<32x128xf32>
    %23 = arith.addf %21, %22 : vector<32x128xf32>
    %c0_7 = arith.constant 0 : index
    %c0_8 = arith.constant 0 : index
    %24 = vector.load %arg5[%c0_7, %c0_8] : memref<32x1xf32, #tpu.memory_space<vmem>>, vector<32x1xf32>
    %25 = vector.broadcast %24 : vector<32x1xf32> to vector<32x128xf32>
    %26 = arith.addf %23, %25 : vector<32x128xf32>
    %cst_9 = arith.constant 0.000000e+00 : f32
    %27 = vector.broadcast %cst_9 : f32 to vector<32x128xf32>
    %28 = arith.maximumf %26, %27 : vector<32x128xf32>
    %c0_10 = arith.constant 0 : index
    %c0_11 = arith.constant 0 : index
    %29 = vector.load %arg4[%c0_10, %c0_11] : memref<16x32xbf16, #tpu.memory_space<vmem>>, vector<16x32xbf16>
    %30 = arith.truncf %28 : vector<32x128xf32> to vector<32x128xbf16>
    %cst_12 = arith.constant dense<0.000000e+00> : vector<16x128xf32>
    %31 = tpu.matmul %29, %30, %cst_12 {dimension_numbers = #tpu.dot_dimension_numbers<[1], [0], [0], [1], [0, 0, 1, 1], [], []>} : vector<16x32xbf16>, vector<32x128xbf16>, vector<16x128xf32> -> vector<16x128xf32>
    %c0_13 = arith.constant 0 : index
    %c0_14 = arith.constant 0 : index
    %32 = vector.load %arg6[%c0_13, %c0_14] : memref<16x1xf32, #tpu.memory_space<vmem>>, vector<16x1xf32>
    %33 = vector.broadcast %32 : vector<16x1xf32> to vector<16x128xf32>
    %34 = arith.addf %31, %33 : vector<16x128xf32>
    %cst_15 = arith.constant 0.000000e+00 : f32
    %35 = vector.broadcast %cst_15 : f32 to vector<16x128xf32>
    %36 = arith.maximumf %34, %35 : vector<16x128xf32>
    %c0_16 = arith.constant 0 : index
    %c0_17 = arith.constant 0 : index
    %37 = vector.load %arg7[%c0_16, %c0_17] : memref<16x1xf32, #tpu.memory_space<vmem>>, vector<16x1xf32>
    %38 = vector.broadcast %37 : vector<16x1xf32> to vector<16x128xf32>
    %39 = arith.mulf %20, %38 : vector<16x128xf32>
    %c0_18 = arith.constant 0 : index
    %c0_19 = arith.constant 0 : index
    %40 = vector.load %arg8[%c0_18, %c0_19] : memref<16x1xf32, #tpu.memory_space<vmem>>, vector<16x1xf32>
    %41 = vector.broadcast %40 : vector<16x1xf32> to vector<16x128xf32>
    %42 = arith.mulf %36, %41 : vector<16x128xf32>
    %43 = arith.addf %39, %42 : vector<16x128xf32>
    %cst_20 = arith.constant dense<0.000000e+00> : vector<128xf32>
    %44 = vector.multi_reduction <add>, %43, %cst_20 [0] : vector<16x128xf32> to vector<128xf32>
    %45 = vector.shape_cast %44 : vector<128xf32> to vector<1x128xf32>
    %c0_21 = arith.constant 0 : index
    %c0_22 = arith.constant 0 : index
    %46 = vector.load %arg9[%c0_21, %c0_22] : memref<1x1xf32, #tpu.memory_space<vmem>>, vector<1x1xf32>
    %47 = vector.broadcast %46 : vector<1x1xf32> to vector<1x128xf32>
    %48 = arith.addf %45, %47 : vector<1x128xf32>
    %c0_23 = arith.constant 0 : index
    %c0_24 = arith.constant 0 : index
    %49 = vector.load %arg10[%c0_23, %c0_24] : memref<1x128xf32, #tpu.memory_space<vmem>>, vector<1x128xf32>
    tpu.vector_store %arg10[%c0_23, %c0_24], %48 {strides = array<i32>} : memref<1x128xf32, #tpu.memory_space<vmem>>, vector<1x128xf32>,
    return
  }
  func.func @transform_0(%arg0: i32) -> (i32, i32) {
    %c0_i32 = arith.constant 0 : i32
    %c0_i32_0 = arith.constant 0 : i32
    return %c0_i32, %arg0 : i32, i32
  }
  func.func @transform_1(%arg0: i32) -> (i32, i32) {
    %c0_i32 = arith.constant 0 : i32
    %c0_i32_0 = arith.constant 0 : i32
    %c0_i32_1 = arith.constant 0 : i32
    return %c0_i32, %c0_i32_0 : i32, i32
  }
  func.func @transform_2(%arg0: i32) -> (i32, i32) {
    %c0_i32 = arith.constant 0 : i32
    %c0_i32_0 = arith.constant 0 : i32
    %c0_i32_1 = arith.constant 0 : i32
    return %c0_i32, %c0_i32_0 : i32, i32
  }
  func.func @transform_3(%arg0: i32) -> (i32, i32) {
    %c0_i32 = arith.constant 0 : i32
    %c0_i32_0 = arith.constant 0 : i32
    %c0_i32_1 = arith.constant 0 : i32
    return %c0_i32, %c0_i32_0 : i32, i32
  }
  func.func @transform_4(%arg0: i32) -> (i32, i32) {
    %c0_i32 = arith.constant 0 : i32
    %c0_i32_0 = arith.constant 0 : i32
    %c0_i32_1 = arith.constant 0 : i32
    return %c0_i32, %c0_i32_0 : i32, i32
  }
  func.func @transform_5(%arg0: i32) -> (i32, i32) {
    %c0_i32 = arith.constant 0 : i32
    %c0_i32_0 = arith.constant 0 : i32
    %c0_i32_1 = arith.constant 0 : i32
    return %c0_i32, %c0_i32_0 : i32, i32
  }
  func.func @transform_6(%arg0: i32) -> (i32, i32) {
    %c0_i32 = arith.constant 0 : i32
    %c0_i32_0 = arith.constant 0 : i32
    %c0_i32_1 = arith.constant 0 : i32
    return %c0_i32, %c0_i32_0 : i32, i32
  }
  func.func @transform_7(%arg0: i32) -> (i32, i32) {
    %c0_i32 = arith.constant 0 : i32
    %c0_i32_0 = arith.constant 0 : i32
    %c0_i32_1 = arith.constant 0 : i32
    return %c0_i32, %c0_i32_0 : i32, i32
  }
  func.func @transform_8(%arg0: i32) -> (i32, i32) {
    %c0_i32 = arith.constant 0 : i32
    %c0_i32_0 = arith.constant 0 : i32
    %c0_i32_1 = arith.constant 0 : i32
    return %c0_i32, %c0_i32_0 : i32, i32
  }
  func.func @transform_9(%arg0: i32) -> (i32, i32) {
    %c0_i32 = arith.constant 0 : i32
    %c0_i32_0 = arith.constant 0 : i32
    return %c0_i32, %arg0 : i32, i32
  }
}

</mosaic_0001>

<bundles_post_ra>
// kernel: tpu_custom_call.1
= control target key start
LH: loop header
LB: loop body
LE: loop exit
PB: predicated region body
PF: predicated region fallthrough
CT: control target
= control target key end

     0   :  { %s679_s0 = inlined_call_operand.vmem [shape: s32[2,128], index: 0, kind: input, shape index: {}]   ;;  %s680_s1 = inlined_call_operand.vmem [shape: bf16[48,16], index: 1, kind: input, shape index: {}]   ;;  %s681_s2 = inlined_call_operand.vmem [shape: bf16[48,24], index: 2, kind: input, shape index: {}]   ;;  %s682_s3 = inlined_call_operand.vmem [shape: bf16[16,32], index: 3, kind: input, shape index: {}]   ;;  %s683_s4 = inlined_call_operand.vmem [shape: f32[32,1], index: 4, kind: input, shape index: {}]   ;;  %s684_s5 = inlined_call_operand.vmem [shape: f32[16,1], index: 5, kind: input, shape index: {}]   ;;  %s685_s6 = inlined_call_operand.vmem [shape: f32[16,1], index: 6, kind: input, shape index: {}]   ;;  %s686_s7 = inlined_call_operand.vmem [shape: f32[16,1], index: 7, kind: input, shape index: {}]   ;;  %s687_s8 = inlined_call_operand.<no memory space> [shape: f32[1,1], index: 8, kind: input, shape index: {}]   ;;  %s688_s9 = inlined_call_operand.hbm [shape: f32[1,128], index: 9, kind: output, shape index: {}]  }
   0x1   :  { %v14_v0 = vstv %s687_s8 }
   0x2   :  { %15 = vst [vmem:[#allocation2] sm:$0x1] %v14_v0 }
   0x3   :  { %v38_v1 = vlaneseq  ;;  %v528_v2 = vmov 0.0   ;;  %v417_v3 = vld [vmem:[%s679_s0] ss:$0 sm:$0xff]  ;;  %vm529_vm0 = vmmov 0   ;;  %v420_v5 = vld [vmem:[%s679_s0 + $0x1] ss:$0 sm:$0xff] }
   0x4   :  { %454 = vmatprep.subr.bf16.mxu0 %v528_v2  ;;  %468 = vmatprep.subr.bf16.mxu1 %v528_v2  ;;  %vm187_vm5 = vcmask 1043456   ;;  %v499_v9 = vld [vmem:[%s680_s1] sm:$0xff]   ;;  %v530_v10 = vmov 0   ;;  %v531_v11 = vmov 1.0|1.0   ;;  %vm89_vm6 = vcmask 130048  }
   0x5   :  { %v591_v4 = vshrl.u32 %v38_v1, 7  ;;  %456 = vmatprep.mubr.msk.bf16.mxu0 %vm529_vm0, %v528_v2  ;;  %472 = vmatprep.mubr.msk.bf16.mxu1 %vm529_vm0, %v528_v2  ;;  %v256_v13 = vld [vmem:[%s683_s4 + $0x10] sm:$0xff]  ;;  %v254_v14 = vld [vmem:[%s683_s4] sm:$0xff]  ;;  %v257_v16 = vld [vmem:[%s683_s4 + $0x18] sm:$0xff] }
   0x6   :  { %497 = vset.pattern.permute.xlu0 %v530_v10  ;;  %498 = vset.pattern.permute.xlu1 %v530_v10  ;;  %v255_v17 = vld [vmem:[%s683_s4 + $0x8] sm:$0xff] }
   0x7   :  { %v40_v6 = vadd.s32 8, %v591_v4  ;;  %vm45_vm1 = vcmp.eq.s32.totalorder %v591_v4, %v417_v3  ;;  %v52_v7 = vadd.s32 16, %v591_v4  ;;  %vm57_vm7 = vcmp.eq.s32.totalorder %v591_v4, %v420_v5  ;;  %270 = vperm.xlu0 %497, %v256_v13   ;;  %260 = vperm.xlu1 %498, %v254_v14  }
   0x9   :  { %vm46_vm2 = vcmp.eq.s32.totalorder %v40_v6, %v417_v3  ;;  %vm59_vm3 = vcmp.eq.s32.totalorder %v52_v7, %v420_v5  ;;  %vm58_vm8 = vcmp.eq.s32.totalorder %v40_v6, %v420_v5 }
   0xa   :  { %vm427_vm4 = vmpackc.low %vm46_vm2, %vm45_vm1  ;;  %v423_v8 = vsel %vm59_vm3, 1.0, %v528_v2 }
   0xb   :  { %455 = vmatpush3.bf16.msk.msra.mxu0 %vm427_vm4, %v531_v11  ;;  %v67_v12 = vpack.c.bf16 %v423_v8, %v423_v8  ;;  %vm435_vm9 = vmpackc.low %vm58_vm8, %vm57_vm7 }
   0xc   :  { %484 = vmatprep.subr.bf16.mxu0 %v528_v2 }
   0xd   :  { %v189_v15 = vsel %vm187_vm5, %v67_v12, 0 }
   0xe   :  { %469 = vmatpush3.bf16.msra.mxu1 %v189_v15  ;;  %457 = vmatmul.mubr.msk.bf16.vlgmr.msra.gmra.mxu0 %vm89_vm6, %v499_v9 }
   0xf   :  { %470 = vmatprep.subr.bf16.mxu1 %v528_v2  ;;  %460 = vmatprep.mubr.msk.bf16.mxu0 %vm529_vm0, %v528_v2 }
  0x10   :  { %16 = vsyncpa [#allocation4], 0  ;;  %275 = vperm.xlu0 %497, %v257_v16   ;;  %v500_v18 = vld [vmem:[%s681_s2] sm:$0xff]   ;;  %265 = vperm.xlu1 %498, %v255_v17   ;;  %vm177_vm10 = vcmask 195584   ;;  %v501_v20 = vld [vmem:[%s680_s1 + $0x8] sm:$0xff]   ;;  %vm307_vm11 = vcmask 261120  }
  0x11   :  { %v290_v19 = vld [vmem:[%s684_s5] sm:$0xff]  ;;  %v291_v21 = vld [vmem:[%s684_s5 + $0x8] sm:$0xff]  ;;  %v503_v26 = vld [vmem:[%s680_s1 + $0x10] sm:$0xff]  }
  0x12   :  { %471 = vmatpush3.bf16.msk.msra.mxu1 %vm435_vm9, %v531_v11  ;;  %v354_v22 = vld [vmem:[%s685_s6] sm:$0xff]  ;;  %v355_v23 = vld [vmem:[%s685_s6 + $0x8] sm:$0xff]  ;;  %v504_v29 = vld [vmem:[%s681_s2 + $0x10] sm:$0xff]  }
  0x13   :  { %v502_v24 = vld [vmem:[%s681_s2 + $0x8] sm:$0xff]   ;;  %v368_v25 = vld [vmem:[%s686_s7] sm:$0xff] }
  0x14   :  { %294 = vperm.xlu0 %497, %v290_v19   ;;  %299 = vperm.xlu1 %498, %v291_v21   ;;  %v369_v27 = vld [vmem:[%s686_s7 + $0x8] sm:$0xff]  ;;  %v391_v28 = vld [vmem:[#allocation2] sm:$0x1] }
  0x15   :  { %473 = vmatmul.mubr.msk.bf16.vlgmr.msra.gmra.mxu1 %vm177_vm10, %v500_v18  ;;  %v505_v12 = vld [vmem:[%s682_s3] sm:$0xff]   ;;  %s532_s3 = smov [#allocation3]  }
  0x16   :  { %461 = vmatmul.mubr.msk.bf16.gmra.mxu0 %vm89_vm6, %v501_v20  ;;  %476 = vmatprep.mubr.msk.bf16.mxu1 %vm529_vm0, %v528_v2  ;;  %s409_s18 = sshll.u32 %s532_s3, 4  ;;  %s410_s18 = int_to_ptr.vmem [resolvable:$true] %s409_s18 }
  0x17   :  { %464 = vmatprep.mubr.msk.bf16.mxu0 %vm529_vm0, %v528_v2  ;;  %s506_s19 = scalar_lea.vmem %s410_s18, 16  ;;  %s510_s20 = scalar_lea.vmem %s410_s18, 32 }
  0x18   :  { %358 = vperm.xlu0 %497, %v354_v22   ;;  %363 = vperm.xlu1 %498, %v355_v23   ;;  %p507_p0 = scmp.ne.s32.totalorder %s410_s18, %s506_s19  ;;  %p511_p1 = scmp.lt.s32.totalorder %s410_s18, %s410_s18 }
  0x19   :  { %p512_p2 = scmp.lt.s32.totalorder %s510_s20, %s506_s19 }
  0x1b   :  { %p513_p3 = por %p512_p2, %p511_p1 }
  0x1c   :  { %372 = vperm.xlu0 %497, %v368_v25   ;;  %377 = vperm.xlu1 %498, %v369_v27  }
  0x1d   :  { %477 = vmatmul.mubr.msk.bf16.gmra.mxu1 %vm177_vm10, %v502_v24  ;;  %p514_p4 = pnand %p513_p3, %p507_p0 }
  0x1e   :  { %465 = vmatmul.mubr.msk.bf16.gmra.mxu0 %vm89_vm6, %v503_v26  ;;  %480 = vmatprep.mubr.msk.bf16.mxu1 %vm529_vm0, %v528_v2 }
  0x1f   :  { %488 = vmatprep.mubr.msk.bf16.mxu0 %vm529_vm0, %v528_v2 }
  0x20   :  { %394 = vperm.xlu0 %497, %v391_v28  }
  0x25   :  { %481 = vmatmul.mubr.msk.bf16.gmra.mxu1 %vm177_vm10, %v504_v29 }
  0x82   :  { %v271_v51 = vpop.permute.xlu0 %270  ;;  %v261_v53 = vpop.permute.xlu1 %260 }
  0x8b   :  { %v276_v59 = vpop.permute.xlu0 %275  ;;  %v266_v63 = vpop.permute.xlu1 %265 }
  0x8f   :  { %v295_v13 = vpop.permute.xlu0 %294  ;;  %v300_v14 = vpop.permute.xlu1 %299 }
  0x93   :  { %v359_v17 = vpop.permute.xlu0 %358  ;;  %v364_v20 = vpop.permute.xlu1 %363 }
  0x97   :  { %v373_v23 = vpop.permute.xlu0 %372  ;;  %v378_v26 = vpop.permute.xlu1 %377 }
  0xce   :  { %v133_v30 = vpop.f32.mrf.mxu0 }
  0xd0   :  { %v458_v31 = vpop.f32.mrf.mxu0 }
  0xd2   :  { %v136_v32 = vpop.f32.mrf.mxu0 }
  0xd4   :  { %v459_v33 = vpop.f32.mrf.mxu0 }
  0xd5   :  { %v225_v34 = vpop.f32.mrf.mxu1 }
  0xd6   :  { %v248_v35 = vmul.f32 %v225_v34, %v133_v30  ;;  %v141_v36 = vpop.f32.mrf.mxu0 }
  0xd7   :  { %v474_v37 = vpop.f32.mrf.mxu1 }
  0xd8   :  { %v462_v38 = vpop.f32.mrf.mxu0  ;;  %v366_v27 = vmul.f32 %v359_v17, %v248_v35  ;;  %v399_v37 = vsub.s32 0, %v591_v4 }
  0xd9   :  { %v228_v39 = vpop.f32.mrf.mxu1 }
  0xda   :  { %v249_v40 = vmul.f32 %v228_v39, %v136_v32  ;;  %v144_v41 = vpop.f32.mrf.mxu0  ;;  %v395_v39 = vpop.permute.xlu0 %394 }
  0xdb   :  { %v475_v42 = vpop.f32.mrf.mxu1 }
  0xdc   :  { %v463_v43 = vpop.f32.mrf.mxu0  ;;  %v367_v28 = vmul.f32 %v364_v20, %v249_v40  ;;  %v400_v42 = vrot.slane %v395_v39, %v399_v37 }
  0xdd   :  { %v233_v44 = vpop.f32.mrf.mxu1 }
  0xde   :  { %v149_v45 = vpop.f32.mrf.mxu0  ;;  %v250_v60 = vadd.f32 %v233_v44, %v141_v36 }
  0xdf   :  { %v478_v46 = vpop.f32.mrf.mxu1 }
  0xe0   :  { %v466_v47 = vpop.f32.mrf.mxu0  ;;  %v278_v5 = vadd.f32 %v261_v53, %v250_v60 }
  0xe1   :  { %v236_v48 = vpop.f32.mrf.mxu1 }
  0xe2   :  { %v152_v49 = vpop.f32.mrf.mxu0  ;;  %v251_v57 = vadd.f32 %v236_v48, %v144_v41  ;;  %v282_v10 = vmax.f32 %v278_v5, 0.0 }
  0xe3   :  { %v479_v50 = vpop.f32.mrf.mxu1 }
  0xe4   :  { %v467_v52 = vpop.f32.mrf.mxu0  ;;  %v279_v1 = vadd.f32 %v266_v63, %v251_v57 }
  0xe5   :  { %v241_v54 = vpop.f32.mrf.mxu1 }
  0xe6   :  { %v252_v55 = vadd.f32 %v241_v54, %v149_v45  ;;  %v283_v8 = vmax.f32 %v279_v1, 0.0 }
  0xe7   :  { %v482_v56 = vpop.f32.mrf.mxu1 }
  0xe8   :  { %v280_v61 = vadd.f32 %v271_v51, %v252_v55  ;;  %v288_v11 = vpack.c.bf16 %v283_v8, %v282_v10 }
  0xe9   :  { %v244_v58 = vpop.f32.mrf.mxu1 }
  0xea   :  { %v253_v62 = vadd.f32 %v244_v58, %v152_v49  ;;  %v284_v6 = vmax.f32 %v280_v61, 0.0 }
  0xeb   :  { %v483_v0 = vpop.f32.mrf.mxu1 }
  0xec   :  { %v281_v3 = vadd.f32 %v276_v59, %v253_v62 }
  0xee   :  { %v285_v7 = vmax.f32 %v281_v3, 0.0 }
  0xf0   :  { %v289_v9 = vpack.c.bf16 %v285_v7, %v284_v6 }
  0xf2   :  { %485 = vmatpush3.bf16.msra.mxu0 %v289_v9 }
  0xf3   :  { %486 = vmatprep.subr.bf16.mxu0 %v528_v2 }
  0xf6   :  { %487 = vmatpush3.bf16.msra.mxu0 %v288_v11 }
  0xf9   :  { %489 = vmatmul.mubr.msk.bf16.vlgmr.msra.gmra.mxu0 %vm307_vm11, %v505_v12 }
 0x1b9   :  { %v345_v15 = vpop.f32.mrf.mxu0 }
 0x1ba   :  { %v346_v16 = vadd.f32 %v345_v15, %v295_v13 }
 0x1bb   :  { %v490_v18 = vpop.f32.mrf.mxu0 }
 0x1bc   :  { %v352_v19 = vmax.f32 %v346_v16, 0.0 }
 0x1bd   :  { %v348_v21 = vpop.f32.mrf.mxu0 }
 0x1be   :  { %v349_v22 = vadd.f32 %v348_v21, %v300_v14  ;;  %v380_v24 = vmul.f32 %v373_v23, %v352_v19 }
 0x1bf   :  { %v491_v2 = vpop.f32.mrf.mxu0 }
 0x1c0   :  { %v353_v25 = vmax.f32 %v349_v22, 0.0  ;;  %v382_v30 = vadd.f32 %v380_v24, %v366_v27 }
 0x1c2   :  { %v381_v29 = vmul.f32 %v378_v26, %v353_v25 }
 0x1c4   :  { %v383_v31 = vadd.f32 %v381_v29, %v367_v28 }
 0x1c6   :  { %v384_v32 = vadd.f32 %v383_v31, %v382_v30 }
 0x1c8   :  { %v385_v33 = vrot.slane %v384_v32, 4 }
 0x1ca   :  { %v386_v34 = vadd.f32 %v385_v33, %v384_v32 }
 0x1cc   :  { %v387_v36 = vrot.slane %v386_v34, 2 }
 0x1ce   :  { %v388_v38 = vadd.f32 %v387_v36, %v386_v34 }
 0x1d0   :  { %v389_v41 = vrot.slane %v388_v38, 1 }
 0x1d2   :  { %v390_v43 = vadd.f32 %v389_v41, %v388_v38 }
 0x1d4   :  { %v401_v44 = vadd.f32 %v400_v42, %v390_v43 }
 0x1d6   :  { %402 = vst [vmem:[#allocation3] sm:$0x1] %v401_v44 }
 0x1d7   :  { %517 = shalt.err (!%p514_p4)
}
 0x1d8   :  { %412 = dma.vmem_to_hbm [thread:$0]  %s410_s18, 16, %s688_s9, [#allocation4]  }
 0x1d9   :  { %526 = dma.done.wait [#allocation4], 16  }
 0x1da   :  { %527 = vsyncadd [#allocation4], 4294967280 }
 0x1db   :  { %416 = vsyncpa [#allocation4], 1 }

</bundles_post_ra>
